<compile_context>
chip_gen: v7x
topology: tpu7x:2x2x1
jax: 0.10.0
libtpu: 0.0.40
codegen_flags: <defaults>
</compile_context>

<pallas_src>
import jax
import jax.numpy as jnp
from jax.experimental import pallas as pl
from jax.experimental.pallas import tpu as pltpu

_LANES = 128


def _round_up(x, m):
    return ((x + m - 1) // m) * m


def _mlp_kernel(x_ref, w1_ref, b1_ref, w2_ref, b2_ref, out_ref):
    # x_ref : (TB, 784) f32      w1_ref: (784, 128) bf16   b1_ref: (1, 128) f32
    # w2_ref: (128, 128) bf16    b2_ref: (1, 128)  f32 (padded cols = -1e30)
    # out_ref: (TB, 10) f32
    n_out = out_ref.shape[-1]

    # In-kernel f32 -> bf16 cast of the streamed x tile (VPU filler in a mem-bound kernel).
    xb = x_ref[...].astype(jnp.bfloat16)

    # Layer 1: Linear(784 -> 128), bf16 MXU matmul with f32 accumulation.
    h = jnp.dot(xb, w1_ref[...], preferred_element_type=jnp.float32)
    a = jax.nn.sigmoid(h + b1_ref[...])  # elementwise math in f32 (no bf16 VPU/EUP on v5e)

    # Layer 2: Linear(128 -> 10), lane-padded to 128 output columns for the MXU.
    logits = jnp.dot(a.astype(w2_ref.dtype), w2_ref[...],
                     preferred_element_type=jnp.float32)
    logits = logits + b2_ref[...]  # padded lanes get -1e30 -> exp() == 0

    # Numerically stable softmax over the (padded) class dimension.
    m = jnp.max(logits, axis=-1, keepdims=True)
    e = jnp.exp(logits - m)
    denom = jnp.sum(e, axis=-1, keepdims=True)
    probs = e * pl.reciprocal(denom, approx=True)  # EUP divide: free slot here

    # Store only the 10 real classes (40 B/row instead of 512 B/row of padding).
    out_ref[...] = probs[:, :n_out].astype(out_ref.dtype)


def net_forward(x_nchw, w1, b1, w2, b2, *, tile_b=1024):
    """x_nchw: (B, C, H, W) float32. Weights use (in_features, out_features) layout."""
    B = x_nchw.shape[0]
    feat = x_nchw.shape[1] * x_nchw.shape[2] * x_nchw.shape[3]
    hidden = w1.shape[1]
    n_out = w2.shape[1]
    n_out_pad = _round_up(max(n_out, _LANES), _LANES)

    # Batch tile: multiple of 8 (sublane), capped by tile_b, and small enough that the
    # grid has >= 2 steps when B allows (so v7x's two TensorCores both get work).
    tb = max(8, min(tile_b, _round_up(pl.cdiv(B, 2), 8)))
    grid = (pl.cdiv(B, tb),)

    # NCHW -> (B, feat) is a free view (== torch.reshape). No pad, no dtype cast here.
    x2d = x_nchw.reshape(B, feat)

    w1b = w1.astype(jnp.bfloat16)
    b1r = b1.reshape(1, hidden).astype(jnp.float32)
    # Lane-pad second layer: zero weights + very negative bias in the padded columns.
    w2p = jnp.zeros((hidden, n_out_pad), jnp.bfloat16).at[:, :n_out].set(
        w2.astype(jnp.bfloat16))
    b2p = jnp.full((1, n_out_pad), -1e30, jnp.float32).at[:, :n_out].set(
        b2.reshape(-1).astype(jnp.float32))

    cost = pl.CostEstimate(
        flops=2 * B * feat * hidden + 2 * B * hidden * n_out_pad,
        transcendentals=B * (hidden + n_out_pad),
        bytes_accessed=(x2d.size * 4 + w1b.size * 2 + w2p.size * 2
                        + b1r.size * 4 + b2p.size * 4 + B * n_out * 4),
    )

    resident = pl.Buffered(1)  # constant block index -> single-buffer the weights/biases

    out = pl.pallas_call(
        _mlp_kernel,
        out_shape=jax.ShapeDtypeStruct((B, n_out), jnp.float32),
        grid_spec=pl.GridSpec(
            grid=grid,
            in_specs=[
                pl.BlockSpec((tb, feat), lambda i: (i, 0)),  # streamed f32 x tiles
                pl.BlockSpec((feat, hidden), lambda i: (0, 0),
                             pipeline_mode=resident),         # resident w1
                pl.BlockSpec((1, hidden), lambda i: (0, 0),
                             pipeline_mode=resident),         # resident b1
                pl.BlockSpec((hidden, n_out_pad), lambda i: (0, 0),
                             pipeline_mode=resident),         # resident w2 (lane-padded)
                pl.BlockSpec((1, n_out_pad), lambda i: (0, 0),
                             pipeline_mode=resident),         # resident b2 (lane-padded)
            ],
            out_specs=pl.BlockSpec((tb, n_out), lambda i: (i, 0)),
        ),
        compiler_params=pltpu.CompilerParams(
            dimension_semantics=("parallel",),  # megacore-shard batch axis on v7x
            vmem_limit_bytes=48 << 20,          # headroom for f32 x streaming at tb=1024
        ),
        cost_estimate=cost,
    )(x2d, w1b, b1r, w2p, b2p)

    return out


if __name__ == "__main__":
    key = jax.random.PRNGKey(0)
    k_x, k_w1, k_b1, k_w2, k_b2 = jax.random.split(key, 5)

    # MNIST-like small input; B=12 deliberately exercises a partial last grid block.
    B, C, H, W = 12, 1, 28, 28
    IN_F, HID, OUT = C * H * W, 128, 10

    x = jax.random.normal(k_x, (B, C, H, W), dtype=jnp.float32)

    # Deterministic parameter init (uniform, roughly matching nn.Linear's scale).
    lim1 = 1.0 / jnp.sqrt(IN_F)
    lim2 = 1.0 / jnp.sqrt(HID)
    w1 = jax.random.uniform(k_w1, (IN_F, HID), jnp.float32, -lim1, lim1)
    b1 = jax.random.uniform(k_b1, (1, HID), jnp.float32, -lim1, lim1)
    w2 = jax.random.uniform(k_w2, (HID, OUT), jnp.float32, -lim2, lim2)
    b2 = jax.random.uniform(k_b2, (1, OUT), jnp.float32, -lim2, lim2)

    out = jax.block_until_ready(net_forward(x, w1, b1, w2, b2))
    assert out.shape == (B, OUT)

    # Reference 1: mimic the kernel's bf16 matmul / f32-accumulate path.
    xb = x.reshape(B, IN_F).astype(jnp.bfloat16)
    h_ref = jnp.dot(xb, w1.astype(jnp.bfloat16),
                    preferred_element_type=jnp.float32) + b1
    a_ref = jax.nn.sigmoid(h_ref)
    logits_ref = jnp.dot(a_ref.astype(jnp.bfloat16), w2.astype(jnp.bfloat16),
                         preferred_element_type=jnp.float32) + b2
    ref_bf16 = jax.nn.softmax(logits_ref, axis=1)
    assert jnp.allclose(out, ref_bf16, atol=2e-3, rtol=2e-3)

    # Reference 2: pure f32 math (loose tol — bounds the bf16 quantization error).
    ref_f32 = jax.nn.softmax(
        jax.nn.sigmoid(x.reshape(B, IN_F) @ w1 + b1) @ w2 + b2, axis=1)
    assert jnp.allclose(out, ref_f32, atol=3e-2, rtol=3e-2)

    # Softmax rows sum to ~1 (approx reciprocal -> slightly looser tolerance).
    assert jnp.allclose(jnp.sum(out, axis=1), 1.0, atol=5e-3)

    print("KERNEL_OK")
</pallas_src>

<mosaic_0001>
module attributes {stable_mosaic.version = 11 : i64} {
  func.func @_mlp_kernel(%arg0: i32, %arg1: memref<8x784xf32, #tpu.memory_space<vmem>>, %arg2: memref<784x128xbf16, #tpu.memory_space<vmem>>, %arg3: memref<1x128xf32, #tpu.memory_space<vmem>>, %arg4: memref<128x128xbf16, #tpu.memory_space<vmem>>, %arg5: memref<1x128xf32, #tpu.memory_space<vmem>>, %arg6: memref<8x10xf32, #tpu.memory_space<vmem>>) attributes {dimension_semantics = [#tpu.dimension_semantics<parallel>], iteration_bounds = array<i64: 2>, scalar_prefetch = 0 : i64, scratch_operands = 0 : i64, tpu.core_type = #tpu.core_type<tc>, window_params = [{transform_indices = @transform_0, window_bounds = array<i64: 8, 784>}, {pipeline_mode = #tpu.pipeline_mode<synchronous>, transform_indices = @transform_1, window_bounds = array<i64: 784, 128>}, {pipeline_mode = #tpu.pipeline_mode<synchronous>, transform_indices = @transform_2, window_bounds = array<i64: 1, 128>}, {pipeline_mode = #tpu.pipeline_mode<synchronous>, transform_indices = @transform_3, window_bounds = array<i64: 128, 128>}, {pipeline_mode = #tpu.pipeline_mode<synchronous>, transform_indices = @transform_4, window_bounds = array<i64: 1, 128>}, {transform_indices = @transform_5, window_bounds = array<i64: 8, 10>}]} {
    %c0 = arith.constant 0 : index
    %c0_0 = arith.constant 0 : index
    %0 = vector.load %arg1[%c0, %c0_0] : memref<8x784xf32, #tpu.memory_space<vmem>>, vector<8x784xf32>
    %1 = arith.truncf %0 : vector<8x784xf32> to vector<8x784xbf16>
    %c0_1 = arith.constant 0 : index
    %c0_2 = arith.constant 0 : index
    %2 = vector.load %arg2[%c0_1, %c0_2] : memref<784x128xbf16, #tpu.memory_space<vmem>>, vector<784x128xbf16>
    %cst = arith.constant dense<0.000000e+00> : vector<8x128xf32>
    %3 = tpu.matmul %1, %2, %cst {dimension_numbers = #tpu.dot_dimension_numbers<[1], [0], [0], [1], [0, 0, 1, 1], [], []>} : vector<8x784xbf16>, vector<784x128xbf16>, vector<8x128xf32> -> vector<8x128xf32>
    %c0_3 = arith.constant 0 : index
    %c0_4 = arith.constant 0 : index
    %4 = vector.load %arg3[%c0_3, %c0_4] : memref<1x128xf32, #tpu.memory_space<vmem>>, vector<1x128xf32>
    %5 = vector.broadcast %4 : vector<1x128xf32> to vector<8x128xf32>
    %6 = arith.addf %3, %5 : vector<8x128xf32>
    %7 = arith.negf %6 : vector<8x128xf32>
    %8 = math.exp %7 : vector<8x128xf32>
    %cst_5 = arith.constant 1.000000e+00 : f32
    %9 = vector.broadcast %cst_5 : f32 to vector<8x128xf32>
    %10 = arith.addf %9, %8 : vector<8x128xf32>
    %11 = arith.divf %9, %10 : vector<8x128xf32>
    %12 = arith.truncf %11 : vector<8x128xf32> to vector<8x128xbf16>
    %c0_6 = arith.constant 0 : index
    %c0_7 = arith.constant 0 : index
    %13 = vector.load %arg4[%c0_6, %c0_7] : memref<128x128xbf16, #tpu.memory_space<vmem>>, vector<128x128xbf16>
    %cst_8 = arith.constant dense<0.000000e+00> : vector<8x128xf32>
    %14 = tpu.matmul %12, %13, %cst_8 {dimension_numbers = #tpu.dot_dimension_numbers<[1], [0], [0], [1], [0, 0, 1, 1], [], []>} : vector<8x128xbf16>, vector<128x128xbf16>, vector<8x128xf32> -> vector<8x128xf32>
    %c0_9 = arith.constant 0 : index
    %c0_10 = arith.constant 0 : index
    %15 = vector.load %arg5[%c0_9, %c0_10] : memref<1x128xf32, #tpu.memory_space<vmem>>, vector<1x128xf32>
    %16 = vector.broadcast %15 : vector<1x128xf32> to vector<8x128xf32>
    %17 = arith.addf %14, %16 : vector<8x128xf32>
    %cst_11 = arith.constant dense<0xFF800000> : vector<8xf32>
    %18 = vector.multi_reduction <maximumf>, %17, %cst_11 [1] : vector<8x128xf32> to vector<8xf32>
    %19 = vector.shape_cast %18 : vector<8xf32> to vector<8x1xf32>
    %20 = vector.broadcast %19 : vector<8x1xf32> to vector<8x128xf32>
    %21 = arith.subf %17, %20 : vector<8x128xf32>
    %22 = math.exp %21 : vector<8x128xf32>
    %cst_12 = arith.constant dense<0.000000e+00> : vector<8xf32>
    %23 = vector.multi_reduction <add>, %22, %cst_12 [1] : vector<8x128xf32> to vector<8xf32>
    %24 = vector.shape_cast %23 : vector<8xf32> to vector<8x1xf32>
    %25 = tpu.reciprocal %24 {approx = true} : vector<8x1xf32> -> vector<8x1xf32>
    %26 = vector.broadcast %25 : vector<8x1xf32> to vector<8x128xf32>
    %27 = arith.mulf %22, %26 : vector<8x128xf32>
    %28 = vector.extract_strided_slice %27 {offsets = [0, 0], sizes = [8, 10], strides = [1, 1]} : vector<8x128xf32> to vector<8x10xf32>
    %c0_13 = arith.constant 0 : index
    %c0_14 = arith.constant 0 : index
    %29 = vector.load %arg6[%c0_13, %c0_14] : memref<8x10xf32, #tpu.memory_space<vmem>>, vector<8x10xf32>
    tpu.vector_store %arg6[%c0_13, %c0_14], %28 {strides = array<i32>} : memref<8x10xf32, #tpu.memory_space<vmem>>, vector<8x10xf32>,
    return
  }
  func.func @transform_0(%arg0: i32) -> (i32, i32) {
    %c0_i32 = arith.constant 0 : i32
    %c0_i32_0 = arith.constant 0 : i32
    return %arg0, %c0_i32 : i32, i32
  }
  func.func @transform_1(%arg0: i32) -> (i32, i32) {
    %c0_i32 = arith.constant 0 : i32
    %c0_i32_0 = arith.constant 0 : i32
    %c0_i32_1 = arith.constant 0 : i32
    return %c0_i32, %c0_i32_0 : i32, i32
  }
  func.func @transform_2(%arg0: i32) -> (i32, i32) {
    %c0_i32 = arith.constant 0 : i32
    %c0_i32_0 = arith.constant 0 : i32
    %c0_i32_1 = arith.constant 0 : i32
    return %c0_i32, %c0_i32_0 : i32, i32
  }
  func.func @transform_3(%arg0: i32) -> (i32, i32) {
    %c0_i32 = arith.constant 0 : i32
    %c0_i32_0 = arith.constant 0 : i32
    %c0_i32_1 = arith.constant 0 : i32
    return %c0_i32, %c0_i32_0 : i32, i32
  }
  func.func @transform_4(%arg0: i32) -> (i32, i32) {
    %c0_i32 = arith.constant 0 : i32
    %c0_i32_0 = arith.constant 0 : i32
    %c0_i32_1 = arith.constant 0 : i32
    return %c0_i32, %c0_i32_0 : i32, i32
  }
  func.func @transform_5(%arg0: i32) -> (i32, i32) {
    %c0_i32 = arith.constant 0 : i32
    %c0_i32_0 = arith.constant 0 : i32
    return %arg0, %c0_i32 : i32, i32
  }
}

</mosaic_0001>

<bundles_post_ra>
// kernel: tpu_custom_call.1
= control target key start
LH: loop header
LB: loop body
LE: loop exit
PB: predicated region body
PF: predicated region fallthrough
CT: control target
= control target key end

     0   :  { %10 = vsyncpa [#allocation3], 0  ;;  %s1851_s0 = inlined_call_operand.hbm [shape: f32[12,784], index: 0, kind: input, shape index: {}]   ;;  %s1852_s1 = inlined_call_operand.hbm [shape: bf16[784,128], index: 1, kind: input, shape index: {}]   ;;  %s1853_s2 = inlined_call_operand.vmem [shape: f32[1,128], index: 2, kind: input, shape index: {}]   ;;  %s1854_s3 = inlined_call_operand.hbm [shape: bf16[128,128], index: 3, kind: input, shape index: {}]   ;;  %s1855_s4 = inlined_call_operand.vmem [shape: f32[1,128], index: 4, kind: input, shape index: {}]   ;;  %s1856_s5 = inlined_call_operand.hbm [shape: f32[12,10], index: 5, kind: output, shape index: {}]  }
   0x1   :  { %12 = vsyncpa [#allocation3 + $0x1], 0 }
   0x2   :  { %13 = vsyncpa [#allocation6], 0 }
   0x3   :  { %14 = vsyncpa [#allocation4], 0 }
   0x4   :  { %16 = vsyncpa [#allocation4 + $0x1], 0  ;;  %s1593_s18 = smov 0   ;;  %s1595_s19 = smov 0  }
   0x5   :  { %s1597_s20 = smov 0   ;;  %s1599_s21 = smov 0  }
   0x6 LB: > { %s1614_s22 = sadd.s32 4294967295, %s1553_s21   ;;  %s1080_s23 = sadd.s32 4294967294, %s1553_s21   ;;  %s1553_s21 = sphi %s1599_s21, %s1876_s21   ;;  %s1549_s20 = sphi %s1597_s20, %s1875_s20   ;;  %s1545_s19 = sphi %s1595_s19, %s1874_s19   ;;  %s1541_s18 = sphi %s1593_s18, %s1873_s18  }
   0x7   : > { %p42_p0 = scmp.ne.s32.totalorder %s1545_s19, %s1541_s18  ;;  %p1857_p1 = scmp.eq.s32.totalorder %s1614_s22, 0 }
   0x8   : > { %p156_p3 = scmp.eq.s32.totalorder %s1080_s23, 1  ;;  %p1081_p5 = scmp.ge.s32.totalorder %s1553_s21, 1 }
   0x9   : > { %p1623_p4 = por %p1857_p1, %p42_p0  ;;  %p163_p7 = scmp.lt.s32.totalorder %s1553_s21, 3 }
   0xa   : > { %p1628_p6 = por %p156_p3, %p42_p0  ;;  %s1555_s27 = smov [#allocation5]  }
   0xb   : > { %s1860_s24 = scalar_select %p1623_p4, 1, 0 }
   0xc   : > { %s1861_s25 = scalar_select %p1628_p6, 1, 0 }
   0xd   : > { %p1633_p8 = pnand %p1081_p5, %p163_p7  ;;  %s175_s28 = sshll.u32 %s1555_s27, 4  ;;  %s1637_s28 = int_to_ptr.vmem [resolvable:$true] %s175_s28 }
   0xe   : > { %s1556_s30 = smov [#allocation7]   ;;  %s1397_s9 = scalar_lea.hbm %s1852_s1, 6272 }
   0xf   : > { %p1273_p9 = pneg %p1633_p8  ;;  %s191_s6 = sshll.u32 %s1556_s30, 4  ;;  %s1648_s6 = int_to_ptr.vmem [resolvable:$true] %s191_s6 }
  0x10   : > { %p1398_p12 = scmp.ne.s32.totalorder %s1852_s1, %s1397_s9  ;;  %p1404_p5 = scmp.lt.u32.totalorder %s1397_s9, %s1852_s1 }
  0x11   : > { %p1644_p11 = pnand %p1273_p9, %p1857_p1 }
  0x13   : > { %p1399_p13 = pneg %p1644_p11 }
  0x15   : > { %p1400_p0 = pnand %p1399_p13, %p1398_p12 }
  0x17   : > { %p1401_p3 = pneg %p1400_p0 }
  0x19   : > { %p1406_p7 = pnand %p1404_p5, %p1401_p3 }
  0x1b   : > { %1409 = shalt.err (!%p1406_p7)
}
  0x1c   : > { %s1410_s14 = scalar_lea.vmem %s1637_s28, 6272  ;;  %p1418_p2 = scmp.lt.s32.totalorder %s1637_s28, %s1637_s28 }
  0x1d   : > { %p1411_p9 = scmp.ne.s32.totalorder %s1637_s28, %s1410_s14  ;;  %p1419_p12 = scmp.lt.s32.totalorder %s1410_s14, %s1410_s14 }
  0x1f   : > { %p1413_p10 = pnand %p1411_p9, %p1399_p13  ;;  %p1420_p0 = por %p1419_p12, %p1418_p2 }
  0x21   : > { %p1414_p1 = pneg %p1413_p10 }
  0x23   : > { %p1421_p6 = pnand %p1420_p0, %p1414_p1 }
  0x25   : > { %1424 = shalt.err (!%p1421_p6)
}
  0x26   : > { %s1557_s15 = smov 64   ;;  %s1558_s16 = smov 4  }
  0x27   : > { %1276 = dma.hbm_to_vmem [thread:$0]  (!%p1644_p11), %s1852_s1, 6272, %s1637_s28, [#allocation6], %s1557_s15, %s1557_s15, %s1558_s16  }
  0x28   : > { %s1425_s7 = scalar_lea.hbm %s1854_s3, 1024 }
  0x29   : > { %p1426_p2 = scmp.ne.s32.totalorder %s1854_s3, %s1425_s7  ;;  %p1432_p10 = scmp.lt.u32.totalorder %s1425_s7, %s1854_s3 }
  0x2b   : > { %p1428_p1 = pnand %p1426_p2, %p1399_p13 }
  0x2d   : > { %p1429_p6 = pneg %p1428_p1 }
  0x2f   : > { %p1434_p3 = pnand %p1432_p10, %p1429_p6 }
  0x31   : > { %1437 = shalt.err (!%p1434_p3)
}
  0x32   : > { %s1438_s28 = scalar_lea.vmem %s1648_s6, 1024  ;;  %p1446_p12 = scmp.lt.s32.totalorder %s1648_s6, %s1648_s6 }
  0x33   : > { %p1439_p5 = scmp.ne.s32.totalorder %s1648_s6, %s1438_s28  ;;  %p1447_p0 = scmp.lt.s32.totalorder %s1438_s28, %s1438_s28 }
  0x35   : > { %p1441_p7 = pnand %p1439_p5, %p1399_p13  ;;  %p1448_p2 = por %p1447_p0, %p1446_p12 }
  0x37   : > { %p1442_p9 = pneg %p1441_p7 }
  0x39   : > { %p1449_p1 = pnand %p1448_p2, %p1442_p9 }
  0x3b   : > { %1452 = shalt.err (!%p1449_p1)
}
  0x3c   : > { %1279 = dma.hbm_to_vmem [thread:$0]  (!%p1644_p11), %s1854_s3, 1024, %s1648_s6, [#allocation6], %s1557_s15, %s1557_s15, %s1558_s16  }
  0x3d   : > { %s1703_s14 = sadd.s32 1, %s1553_s21   ;;  %s29_s29 = sadd.s32 1, %s1549_s20 }
  0x3e   : > { %s26_s17 = ssub.s32 %s1553_s21, %s1703_s14  ;;  %p36_p13 = scmp.ne.s32.totalorder %s1549_s20, %s1545_s19 }
  0x3f   : > { %p27_p6 = scmp.eq.s32.totalorder %s26_s17, 0  ;;  %p37_p10 = scmp.eq.s32.totalorder %s1553_s21, 0 }
  0x40   : > { %p1864_p3 = scmp.eq.s32.totalorder %s1614_s22, 1  ;;  %p1290_p7 = scmp.lt.s32.totalorder %s1553_s21, 2 }
  0x41   : > { %s1719_s27 = scalar_select %p27_p6, %s1549_s20, %s29_s29  }
  0x42   : > { %p1713_p5 = por %p1864_p3, %p36_p13  ;;  %p38_p9 = por %p37_p10, %p36_p13 }
  0x43   : > { %s208_s30 = sand.u32 1, %s1549_s20   ;;  %s1259_s6 = smul.u32 896, %s1553_s21 }
  0x44   : > { %s1865_s23 = scalar_select %p1713_p5, 1, 0 }
  0x45   : > { %s1258_s7 = smul.u32 56, %s208_s30  ;;  %p1723_p11 = pnand %p1290_p7, %p38_p9 }
  0x46   : > { %s1730_s9 = scalar_lea.hbm %s1851_s0, %s1259_s6  ;;  %s209_s28 = scalar_lea.sflag [#allocation3], %s208_s30 }
  0x47   : > { %s212_s10 = scalar_lea.vmem [#allocation2], %s1258_s7  ;;  %s1453_s12 = scalar_lea.hbm %s1730_s9, 896 }
  0x48   : > { %s220_s11 = sshll.u32 %s212_s10, 4  ;;  %p1454_p12 = scmp.ne.s32.totalorder %s1730_s9, %s1453_s12  ;;  %s1732_s11 = int_to_ptr.vmem [resolvable:$true] %s220_s11 }
  0x49   : > { %p1455_p0 = pneg %p1723_p11  ;;  %s1458_s17 = scalar_lea.hbm %s1851_s0, 1792 }
  0x4a   : > { %p1459_p13 = scmp.lt.u32.totalorder %s1730_s9, %s1851_s0  ;;  %p1460_p6 = scmp.lt.u32.totalorder %s1458_s17, %s1453_s12 }
  0x4b   : > { %p1456_p2 = pnand %p1455_p0, %p1454_p12  ;;  %p1462_p3 = scmp.lt.u32.totalorder %s1453_s12, %s1730_s9 }
  0x4c   : > { %p1461_p10 = por %p1460_p6, %p1459_p13 }
  0x4d   : > { %p1457_p1 = pneg %p1456_p2 }
  0x4e   : > { %p1463_p7 = por %p1462_p3, %p1461_p10 }
  0x50   : > { %p1464_p9 = pnand %p1463_p7, %p1457_p1 }
  0x52   : > { %1467 = shalt.err (!%p1464_p9)
}
  0x53   : > { %s1468_s30 = scalar_lea.vmem %s1732_s11, 896  ;;  %s1559_s7 = smov [#allocation2]  }
  0x54   : > { %p1469_p12 = scmp.ne.s32.totalorder %s1732_s11, %s1468_s30  ;;  %s1473_s8 = sshll.u32 %s1559_s7, 4  ;;  %s1474_s8 = int_to_ptr.vmem [resolvable:$false] %s1473_s8 }
  0x55   : > { %s1475_s10 = scalar_lea.vmem %s1474_s8, 1792  ;;  %p1476_p4 = scmp.lt.s32.totalorder %s1732_s11, %s1474_s8 }
  0x56   : > { %p1471_p2 = pnand %p1469_p12, %p1455_p0  ;;  %p1477_p13 = scmp.lt.s32.totalorder %s1475_s10, %s1468_s30 }
  0x58   : > { %p1472_p5 = pneg %p1471_p2  ;;  %p1478_p6 = por %p1477_p13, %p1476_p4 }
  0x5a   : > { %p1479_p10 = pnand %p1478_p6, %p1472_p5 }
  0x5c   : > { %1482 = shalt.err (!%p1479_p10)
}
  0x5d   : > { %1283 = dma.hbm_to_vmem [thread:$0]  (!%p1723_p11), %s1730_s9, 896, %s1732_s11, %s209_s28  }
  0x5e   : > { %229 = sbr.rel (%p1633_p8) target bundleno = 957 (0x3bd), region = 40  ;;  %s1762_s12 = sand.u32 (!%p1633_p8), 1, %s1545_s19  }
  0x5f   : > { %s1260_s13 = smul.u32 (!%p1633_p8), 56, %s1762_s12  ;;  %s232_s29 = scalar_lea.sflag (!%p1633_p8), [#allocation3], %s1762_s12 }
  0x60   : > { %p1867_p4 = scmp.ne.s32.totalorder (!%p1633_p8), %s1860_s24, 0 }
  0x61   : > { %s1766_s17 = scalar_lea.vmem (!%p1633_p8), [#allocation2], %s1260_s13 }
  0x65   : > { %1528 = dma.done.wait (%p1867_p4), %s232_s29, 896  }
  0x66   : > { %1530 = vsyncadd (%p1867_p4), %s232_s29, 4294966400  ;;  %p1868_p5 = scmp.eq.s32.totalorder %s1614_s22, 0 }
  0x68   : > { %1532 = dma.done.wait (%p1868_p5), [#allocation6], 7296   ;;  %p1869_p8 = pmov %p1868_p5 }
  0x69   : > { %v1332_v0 = vld [vmem:[#allocation5 + $0x40] sm:$0xff]   ;;  %v1336_v4 = vld [vmem:[#allocation5 + $0x48] sm:$0xff]   ;;  %v1340_v8 = vld [vmem:[#allocation5 + $0x50] sm:$0xff]   ;;  %v1560_v44 = vmov 0.0   ;;  %vm1561_vm0 = vmmov 0   ;;  %vm684_vm1 = vcmask 130048  }
  0x6a   : > { %1534 = vsyncadd (%p1869_p8), [#allocation6], 4294960000  ;;  %v1333_v1 = vld [vmem:[#allocation5] sm:$0xff]   ;;  %1155 = vmatprep.subr.bf16.mxu0 %v1332_v0  ;;  %v1337_v5 = vld [vmem:[#allocation5 + $0x8] sm:$0xff]   ;;  %s1089_s11 = sshll.u32 %s1762_s12, 3  ;;  %s1152_s28 = sshll.u32 %s1614_s22, 7 }
  0x6b   : > { %v1334_v2 = vld [vmem:[#allocation5 + $0xc0] sm:$0xff]   ;;  %1156 = vmatpush3.bf16.msra.mxu0 %v1333_v1  ;;  %v1338_v6 = vld [vmem:[#allocation5 + $0xc8] sm:$0xff]   ;;  %v1341_v9 = vld [vmem:[#allocation5 + $0x10] sm:$0xff]   ;;  %s269_s6 = scalar_lea.vmem [#allocation8], %s1089_s11  ;;  %vm975_vm2 = vcmask 80896   ;;  %s1807_s8 = scalar_lea.hbm %s1856_s5, %s1152_s28 }
  0x6c   : > { %v1335_v3 = vld [vmem:[#allocation5 + $0x80] sm:$0xff]   ;;  %1177 = vmatprep.subr.bf16.mxu1 %v1334_v2  ;;  %1157 = vmatprep.subr.bf16.mxu0 %v1336_v4  ;;  %v1339_v7 = vld [vmem:[#allocation5 + $0x88] sm:$0xff]   ;;  %v1342_v10 = vld [vmem:[#allocation5 + $0xd0] sm:$0xff]   ;;  %s991_s16 = sshll.u32 %s269_s6, 4  ;;  %s978_s10 = scalar_lea.sflag [#allocation4], %s1762_s12  ;;  %s1809_s16 = int_to_ptr.vmem [resolvable:$true] %s991_s16 }
  0x6d   : > { %1178 = vmatpush3.bf16.msra.mxu1 %v1335_v3  ;;  %v1343_v11 = vld [vmem:[#allocation5 + $0x90] sm:$0xff]   ;;  %v1344_v12 = vld [vmem:[#allocation5 + $0x58] sm:$0xff]   ;;  %v1348_v16 = vld [vmem:[#allocation5 + $0x60] sm:$0xff]   ;;  %s1483_s13 = scalar_lea.vmem %s1809_s16, 128  ;;  %p1870_p0 = scmp.ne.s32.totalorder %s1865_s23, 0 }
  0x6e   : > { %1179 = vmatprep.subr.bf16.mxu1 %v1338_v6  ;;  %v1345_v13 = vld [vmem:[#allocation5 + $0x18] sm:$0xff]   ;;  %v1349_v17 = vld [vmem:[#allocation5 + $0x20] sm:$0xff]   ;;  %v1352_v20 = vld [vmem:[#allocation5 + $0x68] sm:$0xff]   ;;  %p1484_p11 = scmp.ne.s32.totalorder %s1809_s16, %s1483_s13  ;;  %s1562_s22 = smov [#allocation8]  }
  0x6f   : > { %1158 = vmatpush3.bf16.msra.mxu0 %v1337_v5  ;;  %v1346_v14 = vld [vmem:[#allocation5 + $0xd8] sm:$0xff]   ;;  %v1350_v18 = vld [vmem:[#allocation5 + $0xe0] sm:$0xff]   ;;  %v1353_v21 = vld [vmem:[#allocation5 + $0x28] sm:$0xff]   ;;  %s1487_s29 = sshll.u32 %s1562_s22, 4  ;;  %s1488_s29 = int_to_ptr.vmem [resolvable:$false] %s1487_s29 }
  0x70   : > { %1159 = vmatprep.subr.bf16.mxu0 %v1340_v8  ;;  %v1347_v15 = vld [vmem:[#allocation5 + $0x98] sm:$0xff]   ;;  %v1351_v19 = vld [vmem:[#allocation5 + $0xa0] sm:$0xff]   ;;  %v1354_v22 = vld [vmem:[#allocation5 + $0xe8] sm:$0xff]   ;;  %p1485_p1 = pnand %p1484_p11, %p1870_p0  ;;  %p1490_p7 = scmp.lt.s32.totalorder %s1809_s16, %s1488_s29 }
  0x71   : > { %1180 = vmatpush3.bf16.msra.mxu1 %v1339_v7  ;;  %v1355_v23 = vld [vmem:[#allocation5 + $0xa8] sm:$0xff]   ;;  %v1356_v24 = vld [vmem:[#allocation5 + $0x70] sm:$0xff]   ;;  %v1360_v28 = vld [vmem:[#allocation5 + $0x78] sm:$0xff]  }
  0x72   : > { %1181 = vmatprep.subr.bf16.mxu1 %v1342_v10  ;;  %v1357_v25 = vld [vmem:[#allocation5 + $0x30] sm:$0xff]   ;;  %v1361_v29 = vld [vmem:[#allocation5 + $0x38] sm:$0xff]   ;;  %v1364_v36 = vld [vmem:[#allocation5 + $0x140] sm:$0xff]   ;;  %p1486_p3 = pneg %p1485_p1 }
  0x73   : > { %1160 = vmatpush3.bf16.msra.mxu0 %v1341_v9  ;;  %v1358_v26 = vld [vmem:[#allocation5 + $0xf0] sm:$0xff]   ;;  %v1362_v30 = vld [vmem:[#allocation5 + $0xf8] sm:$0xff]   ;;  %v274_v37 = vld [vmem:[%s1766_s17 + $0x18] sm:$0xff] }
  0x74   : > { %1161 = vmatprep.subr.bf16.mxu0 %v1344_v12  ;;  %v1359_v27 = vld [vmem:[#allocation5 + $0xb0] sm:$0xff]   ;;  %v1363_v33 = vld [vmem:[#allocation5 + $0xb8] sm:$0xff]   ;;  %v281_v38 = vpack.c.bf16 %v274_v37, %v274_v37  ;;  %v1365_v39 = vld [vmem:[#allocation5 + $0x100] sm:$0xff]  }
  0x75   : > { %1182 = vmatpush3.bf16.msra.mxu1 %v1343_v11  ;;  %v272_v31 = vld [vmem:[%s1766_s17 + $0x8] sm:$0xff]  ;;  %v271_v34 = vld [vmem:[%s1766_s17] sm:$0xff]  ;;  %v273_v40 = vld [vmem:[%s1766_s17 + $0x10] sm:$0xff] }
  0x76   : > { %1183 = vmatprep.subr.bf16.mxu1 %v1346_v14  ;;  %v279_v32 = vpack.c.bf16 %v272_v31, %v272_v31  ;;  %v278_v35 = vpack.c.bf16 %v271_v34, %v271_v34  ;;  %760 = vmatprep.mubr.bf16.mxu1 %v281_v38  ;;  %v280_v41 = vpack.c.bf16 %v273_v40, %v273_v40  ;;  %v1366_v42 = vld [vmem:[#allocation5 + $0x148] sm:$0xff]   ;;  %v1368_v45 = vld [vmem:[#allocation5 + $0x150] sm:$0xff]   ;;  %v1370_v47 = vld [vmem:[#allocation5 + $0x158] sm:$0xff]  }
  0x77   : > { %1162 = vmatpush3.bf16.msra.mxu0 %v1345_v13  ;;  %v1367_v43 = vld [vmem:[#allocation5 + $0x108] sm:$0xff]   ;;  %v1369_v46 = vld [vmem:[#allocation5 + $0x110] sm:$0xff]   ;;  %v1371_v48 = vld [vmem:[#allocation5 + $0x118] sm:$0xff]  }
  0x78   : > { %1163 = vmatprep.subr.bf16.mxu0 %v1348_v16  ;;  %720 = vmatprep.mubr.bf16.mxu0 %v279_v32  ;;  %v1372_v49 = vld [vmem:[#allocation5 + $0x160] sm:$0xff]   ;;  %v1374_v51 = vld [vmem:[#allocation5 + $0x168] sm:$0xff]   ;;  %v276_v54 = vld [vmem:[%s1766_s17 + $0x28] sm:$0xff] }
  0x79   : > { %1184 = vmatpush3.bf16.msra.mxu1 %v1347_v15  ;;  %v1373_v50 = vld [vmem:[#allocation5 + $0x120] sm:$0xff]   ;;  %v1375_v52 = vld [vmem:[#allocation5 + $0x128] sm:$0xff]   ;;  %v1376_v55 = vld [vmem:[#allocation5 + $0x170] sm:$0xff]   ;;  %v283_v56 = vpack.c.bf16 %v276_v54, %v276_v54 }
  0x7a   : > { %1185 = vmatprep.subr.bf16.mxu1 %v1350_v18  ;;  %v1380_v53 = vld [vmem:[#allocation5 + $0x180] sm:$0xff]   ;;  %v1377_v59 = vld [vmem:[#allocation5 + $0x130] sm:$0xff]   ;;  %v1378_v60 = vld [vmem:[#allocation5 + $0x178] sm:$0xff]  }
  0x7b   : > { %1164 = vmatpush3.bf16.msra.mxu0 %v1349_v17  ;;  %v277_v57 = vld [vmem:[%s1766_s17 + $0x30] sm:$0xff]  ;;  %v275_v62 = vld [vmem:[%s1766_s17 + $0x20] sm:$0xff]  ;;  %s1489_s17 = scalar_lea.vmem %s1488_s29, 256 }
  0x7c   : > { %1165 = vmatprep.subr.bf16.mxu0 %v1352_v20  ;;  %v284_v58 = vpack.c.bf16 %v277_v57, %v277_v57  ;;  %v1379_v61 = vld [vmem:[#allocation5 + $0x138] sm:$0xff]   ;;  %v282_v63 = vpack.c.bf16 %v275_v62, %v275_v62  ;;  %v1381_v0 = vld [vmem:[#allocation7] sm:$0xff]   ;;  %v1382_v1 = vld [vmem:[#allocation7 + $0x8] sm:$0xff]   ;;  %p1491_p9 = scmp.lt.s32.totalorder %s1489_s17, %s1483_s13 }
  0x7d   : > { %1186 = vmatpush3.bf16.msra.mxu1 %v1351_v19  ;;  %v1383_v2 = vld [vmem:[#allocation7 + $0x10] sm:$0xff]   ;;  %v1384_v3 = vld [vmem:[#allocation7 + $0x18] sm:$0xff]   ;;  %v1385_v4 = vld [vmem:[#allocation7 + $0x20] sm:$0xff]  }
  0x7e   : > { %1187 = vmatprep.subr.bf16.mxu1 %v1354_v22  ;;  %v1386_v5 = vld [vmem:[#allocation7 + $0x28] sm:$0xff]   ;;  %v1387_v6 = vld [vmem:[#allocation7 + $0x30] sm:$0xff]   ;;  %v1388_v7 = vld [vmem:[#allocation7 + $0x38] sm:$0xff]   ;;  %p1492_p12 = por %p1491_p9, %p1490_p7 }
  0x7f   : > { %1166 = vmatpush3.bf16.msra.mxu0 %v1353_v21  ;;  %v1090_v9 = vld [vmem:[%s1853_s2] ss:$0 sm:$0xff] }
  0x80   : > { %1167 = vmatprep.subr.bf16.mxu0 %v1356_v24  ;;  %v1142_v37 = vld [vmem:[%s1855_s4] ss:$0 sm:$0xff]  ;;  %p1493_p2 = pnand %p1492_p12, %p1486_p3 }
  0x81   : > { %1188 = vmatpush3.bf16.msra.mxu1 %v1355_v23 }
  0x82   : > { %1189 = vmatprep.subr.bf16.mxu1 %v1358_v26 }
  0x83   : > { %1168 = vmatpush3.bf16.msra.mxu0 %v1357_v25 }
  0x84   : > { %1169 = vmatprep.subr.bf16.mxu0 %v1360_v28 }
  0x85   : > { %1190 = vmatpush3.bf16.msra.mxu1 %v1359_v27 }
  0x86   : > { %1191 = vmatprep.subr.bf16.mxu1 %v1362_v30 }
  0x87   : > { %1170 = vmatpush3.bf16.msra.mxu0 %v1361_v29 }
  0x88   : > { %1199 = vmatprep.subr.bf16.mxu0 %v1364_v36 }
  0x89   : > { %1192 = vmatpush3.bf16.msra.mxu1 %v1363_v33 }
  0x8a   : > { %721 = vmatmul.mubr.bf16.vlgmr.msra.gmra.mrb[0].mxu0 %v278_v35  ;;  %1232 = vmatprep.subr.bf16.mxu1 %v1560_v44 }
  0x8b   : > { %1200 = vmatpush3.bf16.msra.mxu0 %v1365_v39  ;;  %800 = vmatprep.mubr.bf16.mxu0 %v283_v56 }
  0x8c   : > { %761 = vmatmul.mubr.bf16.vlgmr.msra.gmra.mrb[0].mxu1 %v280_v41  ;;  %1201 = vmatprep.subr.bf16.mxu0 %v1366_v42 }
  0x8d   : > { %1234 = vmatprep.mubr.msk.bf16.mxu1 %vm1561_vm0, %v1560_v44  ;;  %1233 = vmatpush3.bf16.msra.mxu1 %v1380_v53 }
  0x8e   : > { %1238 = vmatprep.subr.bf16.mxu1 %v1560_v44 }
  0x8f   : > { %1202 = vmatpush3.bf16.msra.mxu0 %v1367_v43 }
  0x90   : > { %1203 = vmatprep.subr.bf16.mxu0 %v1368_v45 }
  0x93   : > { %1204 = vmatpush3.bf16.msra.mxu0 %v1369_v46 }
  0x94   : > { %1205 = vmatprep.subr.bf16.mxu0 %v1370_v47  ;;  %1235 = vmatmul.mubr.msk.bf16.vlgmr.msra.gmra.mrb[4].mxu1 %vm684_vm1, %v284_v58 }
  0x95   : > { %1254 = vmatprep.mubr.msk.bf16.mxu1 %vm1561_vm0, %v1560_v44  ;;  %1239 = vmatpush3.bf16.msra.mxu1 %v1381_v0 }
  0x96   : > { %1240 = vmatprep.subr.bf16.mxu1 %v1560_v44 }
  0x97   : > { %1206 = vmatpush3.bf16.msra.mxu0 %v1371_v48 }
  0x98   : > { %1207 = vmatprep.subr.bf16.mxu0 %v1372_v49 }
  0x99   : > { %1241 = vmatpush3.bf16.msra.mxu1 %v1382_v1 }
  0x9a   : > { %1242 = vmatprep.subr.bf16.mxu1 %v1560_v44 }
  0x9b   : > { %1208 = vmatpush3.bf16.msra.mxu0 %v1373_v50 }
  0x9c   : > { %1209 = vmatprep.subr.bf16.mxu0 %v1374_v51 }
  0x9d   : > { %1243 = vmatpush3.bf16.msra.mxu1 %v1383_v2 }
  0x9e   : > { %1244 = vmatprep.subr.bf16.mxu1 %v1560_v44 }
  0x9f   : > { %1210 = vmatpush3.bf16.msra.mxu0 %v1375_v52 }
  0xa0   : > { %1211 = vmatprep.subr.bf16.mxu0 %v1376_v55 }
  0xa1   : > { %1245 = vmatpush3.bf16.msra.mxu1 %v1384_v3 }
  0xa2   : > { %1246 = vmatprep.subr.bf16.mxu1 %v1560_v44 }
  0xa3   : > { %1212 = vmatpush3.bf16.msra.mxu0 %v1377_v59 }
  0xa4   : > { %1213 = vmatprep.subr.bf16.mxu0 %v1378_v60 }
  0xa5   : > { %1247 = vmatpush3.bf16.msra.mxu1 %v1385_v4 }
  0xa6   : > { %1248 = vmatprep.subr.bf16.mxu1 %v1560_v44 }
  0xa7   : > { %1214 = vmatpush3.bf16.msra.mxu0 %v1379_v61 }
  0xa9   : > { %1249 = vmatpush3.bf16.msra.mxu1 %v1386_v5 }
  0xaa   : > { %801 = vmatmul.mubr.bf16.vlgmr.msra.gmra.mrb[4].mxu0 %v282_v63  ;;  %1250 = vmatprep.subr.bf16.mxu1 %v1560_v44 }
  0xad   : > { %1251 = vmatpush3.bf16.msra.mxu1 %v1387_v6 }
  0xae   : > { %1252 = vmatprep.subr.bf16.mxu1 %v1560_v44 }
  0xb1   : > { %1253 = vmatpush3.bf16.msra.mxu1 %v1388_v7 }
 0x15d   : > { %v1171_v8 = vpop.f32.mrb[0].mxu0 }
 0x15e   : > { %v1172_v10 = vpop.f32.mrb[1].mxu0 }
 0x15f   : > { %v1173_v11 = vadd.f32 %v1172_v10, %v1171_v8  ;;  %v1174_v12 = vpop.f32.mrb[2].mxu0  ;;  %v1193_v13 = vpop.f32.mrb[0].mxu1 }
 0x160   : > { %v1175_v14 = vpop.f32.mrb[3].mxu0  ;;  %v1194_v16 = vpop.f32.mrb[1].mxu1 }
 0x161   : > { %v723_v15 = vadd.f32 %v1173_v11, %v1090_v9  ;;  %v1195_v17 = vadd.f32 %v1194_v16, %v1193_v13  ;;  %v1196_v18 = vpop.f32.mrb[2].mxu1 }
 0x162   : > { %v1197_v19 = vpop.f32.mrb[3].mxu1 }
 0x163   : > { %v763_v20 = vadd.f32 %v1195_v17, %v723_v15 }
 0x167   : > { %v842_v21 = vpop.f32.mrb[4].mxu1 }
 0x168   : > { %v1236_v22 = vpop.f32.mrb[5].mxu1 }
 0x169   : > { %v845_v23 = vpop.f32.mrb[6].mxu1 }
 0x16a   : > { %v1237_v24 = vpop.f32.mrb[7].mxu1 }
 0x17d   : > { %v1215_v25 = vpop.f32.mrb[4].mxu0 }
 0x17e   : > { %v1216_v26 = vpop.f32.mrb[5].mxu0 }
 0x17f   : > { %v1217_v27 = vadd.f32 %v1216_v26, %v1215_v25  ;;  %v1218_v28 = vpop.f32.mrb[6].mxu0 }
 0x180   : > { %v1219_v29 = vpop.f32.mrb[7].mxu0 }
 0x181   : > { %v803_v30 = vadd.f32 %v1217_v27, %v763_v20 }
 0x183   : > { %v843_v31 = vadd.f32 %v842_v21, %v803_v30 }
 0x185   : > { %v1141_v32 = vmul.f32 -1.442695, %v843_v31 }
 0x187   : > { %1389 = vpow2.f32 %v1141_v32 }
 0x191   : > { %v1390_v33 = vpop.eup %1389 }
 0x192   : > { %v851_v34 = vadd.f32 1.0, %v1390_v33 }
 0x194   : > { %1391 = vrcp.f32 %v851_v34 }
 0x19e   : > { %v1392_v35 = vpop.eup %1391 }
 0x19f   : > { %v854_v36 = vpack.c.bf16 %v1392_v35, %v1392_v35 }
 0x1a1   : > { %1255 = vmatmul.mubr.bf16.vlgmr.msra.gmra.mrb[8].mxu1 %v854_v36 }
 0x274   : > { %v960_v38 = vpop.f32.mrb[8].mxu1 }
 0x275   : > { %v961_v39 = vadd.f32 %v1142_v37, %v960_v38  ;;  %v1256_v40 = vpop.f32.mrb[9].mxu1 }
 0x276   : > { %v963_v41 = vpop.f32.mrb[10].mxu1 }
 0x277   : > { %966 = vmax.xlane.f32.xlu0 %v961_v39  ;;  %v1257_v42 = vpop.f32.mrb[11].mxu1 }
 0x304   : > { %v967_v43 = vpop.xlane.xlu0 %966 }
 0x305   : > { %v968_v44 = vsub.f32 %v961_v39, %v967_v43 }
 0x307   : > { %v969_v45 = vmul.f32 1.442695, %v968_v44 }
 0x309   : > { %1393 = vpow2.f32 %v969_v45 }
 0x313   : > { %v1394_v46 = vpop.eup %1393 }
 0x314   : > { %971 = vadd.xlane.f32.xlu0 %v1394_v46 }
 0x3a1   : > { %v972_v47 = vpop.xlane.xlu0 %971 }
 0x3a2   : > { %1395 = vrcp.f32 %v972_v47 }
 0x3ac   : > { %v1396_v48 = vpop.eup %1395 }
 0x3ad   : > { %v974_v49 = vmul.f32 %v1396_v48, %v1394_v46 }
 0x3af   : > { %976 = vst.msk [vmem:[%s269_s6] sm:$0xff] %vm975_vm2, %v974_v49 }
 0x3b0   : > { %1496 = shalt.err (!%p1493_p2)
}
 0x3b1   : > { %s1497_s12 = scalar_lea.hbm %s1807_s8, 128  ;;  %s1501_s15 = scalar_lea.hbm %s1856_s5, 256 }
 0x3b2   : > { %p1498_p13 = scmp.ne.s32.totalorder %s1807_s8, %s1497_s12  ;;  %p1502_p4 = scmp.lt.u32.totalorder %s1807_s8, %s1856_s5 }
 0x3b3   : > { %p1503_p5 = scmp.lt.u32.totalorder %s1501_s15, %s1497_s12  ;;  %p1505_p11 = scmp.lt.u32.totalorder %s1497_s12, %s1807_s8 }
 0x3b4   : > { %p1499_p6 = pnand %p1498_p13, %p1870_p0 }
 0x3b5   : > { %p1504_p8 = por %p1503_p5, %p1502_p4 }
 0x3b6   : > { %p1500_p10 = pneg %p1499_p6 }
 0x3b7   : > { %p1506_p1 = por %p1505_p11, %p1504_p8 }
 0x3b9   : > { %p1507_p3 = pnand %p1506_p1, %p1500_p10 }
 0x3bb   : > { %1510 = shalt.err (!%p1507_p3)
}
 0x3bc   : > { %1271 = dma.vmem_to_hbm [thread:$0]  (%p1870_p0), %s1809_s16, 128, %s1807_s8, %s978_s10  }
 0x3bd PF: > { %s1003_s28 = sand.u32 1, %s1541_s18   ;;  %p1871_p7 = scmp.ne.s32.totalorder %s1861_s25, 0 }
 0x3be   : > { %p1872_p9 = scmp.ge.s32.totalorder %s1553_s21, 2  ;;  %s1004_s6 = scalar_lea.sflag [#allocation4], %s1003_s28 }
 0x3c0   : > { %p1285_p12 = pnand %p1872_p9, %p1871_p7 }
 0x3c2   : > { %1536 = dma.done.wait (!%p1285_p12), %s1004_s6, 128  }
 0x3c3   : > { %1538 = vsyncadd (!%p1285_p12), %s1004_s6, 4294967168  ;;  %p19_p2 = scmp.ge.s32.totalorder %s1703_s14, 4   ;;  %s1873_s18 = smov %s1545_s19 }
 0x3c4   : > { %s1874_s19 = smov %s1549_s20  ;;  %s1875_s20 = smov %s1719_s27 }
 0x3c5   : > { %s1876_s21 = smov %s1703_s14  ;;  %21 = sbr.rel (!%p19_p2) target bundleno = 6 (0x6), region = 93 }
 0x3cc   :  { %1009 = vsyncpa [#allocation3], 1 }
 0x3cd   :  { %1011 = vsyncpa [#allocation3 + $0x1], 1 }
 0x3ce   :  { %1012 = vsyncpa [#allocation6], 1 }
 0x3cf   :  { %1013 = vsyncpa [#allocation4], 1 }
 0x3d0   :  { %1015 = vsyncpa [#allocation4 + $0x1], 1 }

</bundles_post_ra>
